<compile_context>
chip_gen: v5e
topology: v5e:2x2
jax: 0.10.0
libtpu: 0.0.40
codegen_flags: <defaults>
</compile_context>

<pallas_src>
import math
import jax
import jax.numpy as jnp
from jax import lax
from jax.experimental import pallas as pl
from jax.experimental.pallas import tpu as pltpu

# ---------------- configuration (small, deterministic) ----------------
B = 2            # batch
C = 32           # channels
C_OUT = 32       # out_channels
H = 4            # n_heads
K = C // H       # k_channels (= 8, one lane group per head)
T_T = 8          # query length  (t_t)
T_S = 16         # key/value length (t_s) -- cross-attention (window_size=None)


def mha_kernel(x_ref, c_ref, wb_ref, o_ref):
    # x_ref:  (B*T_T, C)        time-major query source
    # c_ref:  (B*T_S, C)        time-major key/value source
    # wb_ref: (C+1, 3C+C_OUT)   fused slab: rows [0:C] weights, row C biases;
    #                           cols [0:C]=q (pre-scaled by 1/sqrt(K)),
    #                           cols [C:3C]=k,v, cols [3C:]=o
    # o_ref:  (B*T_T, C_OUT)    time-major output (single lane-dense store)
    wb = wb_ref[...]
    w = wb[:C, :]                     # (C, 3C+C_OUT)
    bias = wb[C:C + 1, :]             # (1, 3C+C_OUT)

    x_tm = x_ref[...]                 # (B*T_T, C)
    c_tm = c_ref[...]                 # (B*T_S, C)

    dn2 = (((1,), (0,)), ((), ()))    # standard 2-D matmul (contract minor of lhs)

    # Projections: 1x1 Conv1d == matmul, batched over B via the fused time axis.
    # q is already scaled by 1/sqrt(K) through the fused weights/bias.
    q_tm = lax.dot_general(x_tm, w[:, :C], dn2,
                           preferred_element_type=jnp.float32) + bias[:, :C]          # (B*T_T, C)
    kv_tm = lax.dot_general(c_tm, w[:, C:3 * C], dn2,
                            preferred_element_type=jnp.float32) + bias[:, C:3 * C]    # (B*T_S, 2C)

    # Pure (sublane-tile aligned) views: split the fused time axis back into (B, T).
    q3 = q_tm.reshape(B, T_T, C)              # (B, T_T, C)
    k3 = kv_tm[:, :C].reshape(B, T_S, C)      # (B, T_S, C)
    v3 = kv_tm[:, C:].reshape(B, T_S, C)      # (B, T_S, C)

    dn_qk = (((2,), (2,)), ((0,), (0,)))      # 'btk,bsk->bts' (contract minor of both)
    dn_pv = (((2,), (1,)), ((0,), (0,)))      # 'bts,bsk->btk' (standard batched matmul)

    o_heads = []
    for h in range(H):                        # static unroll over heads (lane-group slices)
        sl = slice(h * K, (h + 1) * K)
        qh = q3[:, :, sl]                     # (B, T_T, K)
        kh = k3[:, :, sl]                     # (B, T_S, K)
        vh = v3[:, :, sl]                     # (B, T_S, K)

        s = lax.dot_general(qh, kh, dn_qk, preferred_element_type=jnp.float32)   # (B, T_T, T_S)
        # Numerically stable softmax over the key axis (lane axis); exact division.
        s = s - jnp.max(s, axis=-1, keepdims=True)
        e = jnp.exp(s)
        p = e / jnp.sum(e, axis=-1, keepdims=True)

        o_heads.append(
            lax.dot_general(p, vh, dn_pv, preferred_element_type=jnp.float32))   # (B, T_T, K)

    # Lane-concat heads back to full channel width; pure view back to time-major 2-D.
    attn_tm = jnp.concatenate(o_heads, axis=-1).reshape(B * T_T, C)               # (B*T_T, C)

    # Output 1x1 conv, time-major: one matmul, one contiguous store.
    y = lax.dot_general(attn_tm, w[:, 3 * C:], dn2,
                        preferred_element_type=jnp.float32) + bias[:, 3 * C:]     # (B*T_T, C_OUT)
    o_ref[...] = y.astype(o_ref.dtype)


def make_fused_params(params):
    """One-time (hoisted) weight plumbing: fused (C+1, 3C+C_OUT) weight+bias slab.

    Columns [0:C] hold conv_q (transposed) pre-scaled by 1/sqrt(K); [C:2C]=conv_k,
    [2C:3C]=conv_v, [3C:]=conv_o.  Row C holds the (matching-scaled) biases.
    """
    wq, bq, wk, bk, wv, bv, wo, bo = params
    scale = 1.0 / math.sqrt(K)
    w_all = jnp.concatenate(
        [wq.T * scale, wk.T, wv.T, wo.T], axis=1)                       # (C, 3C+C_OUT)
    b_all = jnp.concatenate(
        [bq[:, 0] * scale, bk[:, 0], bv[:, 0], bo[:, 0]])[None, :]      # (1, 3C+C_OUT)
    return jnp.concatenate([w_all, b_all], axis=0)                      # (C+1, 3C+C_OUT)


@jax.jit
def multi_head_attention(x, c, wb_all):
    # Time-major activation prep (once, in the wrapper): (B, C, T) -> (B*T, C).
    x_tm = jnp.transpose(x, (0, 2, 1)).reshape(B * T_T, C)
    c_tm = jnp.transpose(c, (0, 2, 1)).reshape(B * T_S, C)

    vmem = pl.BlockSpec(memory_space=pltpu.MemorySpace.VMEM)
    out_tm = pl.pallas_call(
        mha_kernel,
        out_shape=jax.ShapeDtypeStruct((B * T_T, C_OUT), jnp.float32),
        in_specs=[vmem, vmem, vmem],
        out_specs=vmem,
    )(x_tm, c_tm, wb_all)

    # Back to PyTorch's channels-first layout (B, C_OUT, T_T).
    return jnp.transpose(out_tm.reshape(B, T_T, C_OUT), (0, 2, 1))


def reference(x, c, params):
    """Pure-JAX reference matching the PyTorch forward (default config)."""
    wq, bq, wk, bk, wv, bv, wo, bo = params
    q = jnp.einsum('oi,bit->bot', wq, x) + bq[None]          # (B, C, T_T)
    k = jnp.einsum('oi,bit->bot', wk, c) + bk[None]          # (B, C, T_S)
    v = jnp.einsum('oi,bit->bot', wv, c) + bv[None]
    # view(b, H, K, T).transpose(2, 3) -> (B, H, T, K)
    qh = q.reshape(B, H, K, T_T).transpose(0, 1, 3, 2)
    kh = k.reshape(B, H, K, T_S).transpose(0, 1, 3, 2)
    vh = v.reshape(B, H, K, T_S).transpose(0, 1, 3, 2)
    scores = jnp.einsum('bhtk,bhsk->bhts', qh / math.sqrt(K), kh)
    p = jax.nn.softmax(scores, axis=-1)
    out = jnp.einsum('bhts,bhsk->bhtk', p, vh)               # (B, H, T_T, K)
    out = out.transpose(0, 1, 3, 2).reshape(B, C, T_T)
    return jnp.einsum('oi,bit->bot', wo, out) + bo[None]


def init_params(key):
    ks = jax.random.split(key, 8)
    limit = math.sqrt(6.0 / (C + C))        # xavier_uniform for 1x1 conv
    def xavier(k, shape):
        return jax.random.uniform(k, shape, jnp.float32, -limit, limit)
    bbound = 1.0 / math.sqrt(C)             # default Conv1d bias init range
    def bias(k, n):
        return jax.random.uniform(k, (n, 1), jnp.float32, -bbound, bbound)
    wq = xavier(ks[0], (C, C));     bq = bias(ks[1], C)
    wk = xavier(ks[2], (C, C));     bk = bias(ks[3], C)
    wv = xavier(ks[4], (C, C));     bv = bias(ks[5], C)
    wo = xavier(ks[6], (C_OUT, C)); bo = bias(ks[7], C_OUT)
    return (wq, bq, wk, bk, wv, bv, wo, bo)


if __name__ == "__main__":
    key = jax.random.PRNGKey(0)
    kx, kc, kp = jax.random.split(key, 3)
    x = jax.random.normal(kx, (B, C, T_T), jnp.float32)   # query source
    c = jax.random.normal(kc, (B, C, T_S), jnp.float32)   # key/value source
    params = init_params(kp)

    # Hoisted per-model weight fusion (NOT part of the per-call path).
    wb_all = jax.block_until_ready(make_fused_params(params))

    out = multi_head_attention(x, c, wb_all)
    out = jax.block_until_ready(out)

    ref = reference(x, c, params)
    assert out.shape == (B, C_OUT, T_T)
    assert jnp.allclose(out, ref, atol=1e-4, rtol=1e-4), "mismatch vs reference"

    # TODO(synk): relative-position attention (window_size), proximal_bias,
    # block_length masking and dropout paths are inactive under the default
    # constructor args and are not implemented in the kernel.
    print("KERNEL_OK")
</pallas_src>

<mosaic_0001>
module attributes {stable_mosaic.version = 11 : i64} {
  func.func @mha_kernel(%arg0: memref<16x32xf32, #tpu.memory_space<vmem>>, %arg1: memref<32x32xf32, #tpu.memory_space<vmem>>, %arg2: memref<33x128xf32, #tpu.memory_space<vmem>>, %arg3: memref<16x32xf32, #tpu.memory_space<vmem>>) attributes {dimension_semantics = [], scalar_prefetch = 0 : i64, scratch_operands = 0 : i64, tpu.core_type = #tpu.core_type<tc>} {
    %c0 = arith.constant 0 : index
    %c0_0 = arith.constant 0 : index
    %0 = vector.load %arg2[%c0, %c0_0] : memref<33x128xf32, #tpu.memory_space<vmem>>, vector<33x128xf32>
    %1 = vector.extract_strided_slice %0 {offsets = [0, 0], sizes = [32, 128], strides = [1, 1]} : vector<33x128xf32> to vector<32x128xf32>
    %2 = vector.extract_strided_slice %0 {offsets = [32, 0], sizes = [1, 128], strides = [1, 1]} : vector<33x128xf32> to vector<1x128xf32>
    %c0_1 = arith.constant 0 : index
    %c0_2 = arith.constant 0 : index
    %3 = vector.load %arg0[%c0_1, %c0_2] : memref<16x32xf32, #tpu.memory_space<vmem>>, vector<16x32xf32>
    %c0_3 = arith.constant 0 : index
    %c0_4 = arith.constant 0 : index
    %4 = vector.load %arg1[%c0_3, %c0_4] : memref<32x32xf32, #tpu.memory_space<vmem>>, vector<32x32xf32>
    %5 = vector.extract_strided_slice %1 {offsets = [0, 0], sizes = [32, 32], strides = [1, 1]} : vector<32x128xf32> to vector<32x32xf32>
    %cst = arith.constant dense<0.000000e+00> : vector<16x32xf32>
    %6 = tpu.matmul %3, %5, %cst {dimension_numbers = #tpu.dot_dimension_numbers<[1], [0], [0], [1], [0, 0, 1, 1], [], []>} : vector<16x32xf32>, vector<32x32xf32>, vector<16x32xf32> -> vector<16x32xf32>
    %7 = vector.extract_strided_slice %2 {offsets = [0, 0], sizes = [1, 32], strides = [1, 1]} : vector<1x128xf32> to vector<1x32xf32>
    %8 = vector.broadcast %7 : vector<1x32xf32> to vector<16x32xf32>
    %9 = arith.addf %6, %8 : vector<16x32xf32>
    %10 = vector.extract_strided_slice %1 {offsets = [0, 32], sizes = [32, 64], strides = [1, 1]} : vector<32x128xf32> to vector<32x64xf32>
    %cst_5 = arith.constant dense<0.000000e+00> : vector<32x64xf32>
    %11 = tpu.matmul %4, %10, %cst_5 {dimension_numbers = #tpu.dot_dimension_numbers<[1], [0], [0], [1], [0, 0, 1, 1], [], []>} : vector<32x32xf32>, vector<32x64xf32>, vector<32x64xf32> -> vector<32x64xf32>
    %12 = vector.extract_strided_slice %2 {offsets = [0, 32], sizes = [1, 64], strides = [1, 1]} : vector<1x128xf32> to vector<1x64xf32>
    %13 = vector.broadcast %12 : vector<1x64xf32> to vector<32x64xf32>
    %14 = arith.addf %11, %13 : vector<32x64xf32>
    %15 = vector.shape_cast %9 : vector<16x32xf32> to vector<2x8x32xf32>
    %16 = vector.extract_strided_slice %14 {offsets = [0, 0], sizes = [32, 32], strides = [1, 1]} : vector<32x64xf32> to vector<32x32xf32>
    %17 = vector.shape_cast %16 : vector<32x32xf32> to vector<2x16x32xf32>
    %18 = vector.extract_strided_slice %14 {offsets = [0, 32], sizes = [32, 32], strides = [1, 1]} : vector<32x64xf32> to vector<32x32xf32>
    %19 = vector.shape_cast %18 : vector<32x32xf32> to vector<2x16x32xf32>
    %20 = vector.extract_strided_slice %15 {offsets = [0, 0, 0], sizes = [2, 8, 8], strides = [1, 1, 1]} : vector<2x8x32xf32> to vector<2x8x8xf32>
    %21 = vector.extract_strided_slice %17 {offsets = [0, 0, 0], sizes = [2, 16, 8], strides = [1, 1, 1]} : vector<2x16x32xf32> to vector<2x16x8xf32>
    %22 = vector.extract_strided_slice %19 {offsets = [0, 0, 0], sizes = [2, 16, 8], strides = [1, 1, 1]} : vector<2x16x32xf32> to vector<2x16x8xf32>
    %cst_6 = arith.constant dense<0.000000e+00> : vector<2x8x16xf32>
    %23 = tpu.matmul %20, %21, %cst_6 {dimension_numbers = #tpu.dot_dimension_numbers<[2], [2], [1], [1], [0, 0, 0, 1, 1, 1], [0], [0]>} : vector<2x8x8xf32>, vector<2x16x8xf32>, vector<2x8x16xf32> -> vector<2x8x16xf32>
    %cst_7 = arith.constant dense<0xFF800000> : vector<2x8xf32>
    %24 = vector.multi_reduction <maximumf>, %23, %cst_7 [2] : vector<2x8x16xf32> to vector<2x8xf32>
    %25 = vector.shape_cast %24 : vector<2x8xf32> to vector<2x8x1xf32>
    %26 = vector.broadcast %25 : vector<2x8x1xf32> to vector<2x8x16xf32>
    %27 = arith.subf %23, %26 : vector<2x8x16xf32>
    %28 = math.exp %27 : vector<2x8x16xf32>
    %cst_8 = arith.constant dense<0.000000e+00> : vector<2x8xf32>
    %29 = vector.multi_reduction <add>, %28, %cst_8 [2] : vector<2x8x16xf32> to vector<2x8xf32>
    %30 = vector.shape_cast %29 : vector<2x8xf32> to vector<2x8x1xf32>
    %31 = vector.broadcast %30 : vector<2x8x1xf32> to vector<2x8x16xf32>
    %32 = arith.divf %28, %31 : vector<2x8x16xf32>
    %cst_9 = arith.constant dense<0.000000e+00> : vector<2x8x8xf32>
    %33 = tpu.matmul %32, %22, %cst_9 {dimension_numbers = #tpu.dot_dimension_numbers<[2], [1], [1], [2], [0, 0, 0, 1, 1, 2], [0], [0]>} : vector<2x8x16xf32>, vector<2x16x8xf32>, vector<2x8x8xf32> -> vector<2x8x8xf32>
    %34 = vector.extract_strided_slice %15 {offsets = [0, 0, 8], sizes = [2, 8, 8], strides = [1, 1, 1]} : vector<2x8x32xf32> to vector<2x8x8xf32>
    %35 = vector.extract_strided_slice %17 {offsets = [0, 0, 8], sizes = [2, 16, 8], strides = [1, 1, 1]} : vector<2x16x32xf32> to vector<2x16x8xf32>
    %36 = vector.extract_strided_slice %19 {offsets = [0, 0, 8], sizes = [2, 16, 8], strides = [1, 1, 1]} : vector<2x16x32xf32> to vector<2x16x8xf32>
    %cst_10 = arith.constant dense<0.000000e+00> : vector<2x8x16xf32>
    %37 = tpu.matmul %34, %35, %cst_10 {dimension_numbers = #tpu.dot_dimension_numbers<[2], [2], [1], [1], [0, 0, 0, 1, 1, 1], [0], [0]>} : vector<2x8x8xf32>, vector<2x16x8xf32>, vector<2x8x16xf32> -> vector<2x8x16xf32>
    %cst_11 = arith.constant dense<0xFF800000> : vector<2x8xf32>
    %38 = vector.multi_reduction <maximumf>, %37, %cst_11 [2] : vector<2x8x16xf32> to vector<2x8xf32>
    %39 = vector.shape_cast %38 : vector<2x8xf32> to vector<2x8x1xf32>
    %40 = vector.broadcast %39 : vector<2x8x1xf32> to vector<2x8x16xf32>
    %41 = arith.subf %37, %40 : vector<2x8x16xf32>
    %42 = math.exp %41 : vector<2x8x16xf32>
    %cst_12 = arith.constant dense<0.000000e+00> : vector<2x8xf32>
    %43 = vector.multi_reduction <add>, %42, %cst_12 [2] : vector<2x8x16xf32> to vector<2x8xf32>
    %44 = vector.shape_cast %43 : vector<2x8xf32> to vector<2x8x1xf32>
    %45 = vector.broadcast %44 : vector<2x8x1xf32> to vector<2x8x16xf32>
    %46 = arith.divf %42, %45 : vector<2x8x16xf32>
    %cst_13 = arith.constant dense<0.000000e+00> : vector<2x8x8xf32>
    %47 = tpu.matmul %46, %36, %cst_13 {dimension_numbers = #tpu.dot_dimension_numbers<[2], [1], [1], [2], [0, 0, 0, 1, 1, 2], [0], [0]>} : vector<2x8x16xf32>, vector<2x16x8xf32>, vector<2x8x8xf32> -> vector<2x8x8xf32>
    %48 = vector.extract_strided_slice %15 {offsets = [0, 0, 16], sizes = [2, 8, 8], strides = [1, 1, 1]} : vector<2x8x32xf32> to vector<2x8x8xf32>
    %49 = vector.extract_strided_slice %17 {offsets = [0, 0, 16], sizes = [2, 16, 8], strides = [1, 1, 1]} : vector<2x16x32xf32> to vector<2x16x8xf32>
    %50 = vector.extract_strided_slice %19 {offsets = [0, 0, 16], sizes = [2, 16, 8], strides = [1, 1, 1]} : vector<2x16x32xf32> to vector<2x16x8xf32>
    %cst_14 = arith.constant dense<0.000000e+00> : vector<2x8x16xf32>
    %51 = tpu.matmul %48, %49, %cst_14 {dimension_numbers = #tpu.dot_dimension_numbers<[2], [2], [1], [1], [0, 0, 0, 1, 1, 1], [0], [0]>} : vector<2x8x8xf32>, vector<2x16x8xf32>, vector<2x8x16xf32> -> vector<2x8x16xf32>
    %cst_15 = arith.constant dense<0xFF800000> : vector<2x8xf32>
    %52 = vector.multi_reduction <maximumf>, %51, %cst_15 [2] : vector<2x8x16xf32> to vector<2x8xf32>
    %53 = vector.shape_cast %52 : vector<2x8xf32> to vector<2x8x1xf32>
    %54 = vector.broadcast %53 : vector<2x8x1xf32> to vector<2x8x16xf32>
    %55 = arith.subf %51, %54 : vector<2x8x16xf32>
    %56 = math.exp %55 : vector<2x8x16xf32>
    %cst_16 = arith.constant dense<0.000000e+00> : vector<2x8xf32>
    %57 = vector.multi_reduction <add>, %56, %cst_16 [2] : vector<2x8x16xf32> to vector<2x8xf32>
    %58 = vector.shape_cast %57 : vector<2x8xf32> to vector<2x8x1xf32>
    %59 = vector.broadcast %58 : vector<2x8x1xf32> to vector<2x8x16xf32>
    %60 = arith.divf %56, %59 : vector<2x8x16xf32>
    %cst_17 = arith.constant dense<0.000000e+00> : vector<2x8x8xf32>
    %61 = tpu.matmul %60, %50, %cst_17 {dimension_numbers = #tpu.dot_dimension_numbers<[2], [1], [1], [2], [0, 0, 0, 1, 1, 2], [0], [0]>} : vector<2x8x16xf32>, vector<2x16x8xf32>, vector<2x8x8xf32> -> vector<2x8x8xf32>
    %62 = vector.extract_strided_slice %15 {offsets = [0, 0, 24], sizes = [2, 8, 8], strides = [1, 1, 1]} : vector<2x8x32xf32> to vector<2x8x8xf32>
    %63 = vector.extract_strided_slice %17 {offsets = [0, 0, 24], sizes = [2, 16, 8], strides = [1, 1, 1]} : vector<2x16x32xf32> to vector<2x16x8xf32>
    %64 = vector.extract_strided_slice %19 {offsets = [0, 0, 24], sizes = [2, 16, 8], strides = [1, 1, 1]} : vector<2x16x32xf32> to vector<2x16x8xf32>
    %cst_18 = arith.constant dense<0.000000e+00> : vector<2x8x16xf32>
    %65 = tpu.matmul %62, %63, %cst_18 {dimension_numbers = #tpu.dot_dimension_numbers<[2], [2], [1], [1], [0, 0, 0, 1, 1, 1], [0], [0]>} : vector<2x8x8xf32>, vector<2x16x8xf32>, vector<2x8x16xf32> -> vector<2x8x16xf32>
    %cst_19 = arith.constant dense<0xFF800000> : vector<2x8xf32>
    %66 = vector.multi_reduction <maximumf>, %65, %cst_19 [2] : vector<2x8x16xf32> to vector<2x8xf32>
    %67 = vector.shape_cast %66 : vector<2x8xf32> to vector<2x8x1xf32>
    %68 = vector.broadcast %67 : vector<2x8x1xf32> to vector<2x8x16xf32>
    %69 = arith.subf %65, %68 : vector<2x8x16xf32>
    %70 = math.exp %69 : vector<2x8x16xf32>
    %cst_20 = arith.constant dense<0.000000e+00> : vector<2x8xf32>
    %71 = vector.multi_reduction <add>, %70, %cst_20 [2] : vector<2x8x16xf32> to vector<2x8xf32>
    %72 = vector.shape_cast %71 : vector<2x8xf32> to vector<2x8x1xf32>
    %73 = vector.broadcast %72 : vector<2x8x1xf32> to vector<2x8x16xf32>
    %74 = arith.divf %70, %73 : vector<2x8x16xf32>
    %cst_21 = arith.constant dense<0.000000e+00> : vector<2x8x8xf32>
    %75 = tpu.matmul %74, %64, %cst_21 {dimension_numbers = #tpu.dot_dimension_numbers<[2], [1], [1], [2], [0, 0, 0, 1, 1, 2], [0], [0]>} : vector<2x8x16xf32>, vector<2x16x8xf32>, vector<2x8x8xf32> -> vector<2x8x8xf32>
    %76 = tpu.concatenate %33, %47, %61, %75 in 2 : vector<2x8x8xf32>, vector<2x8x8xf32>, vector<2x8x8xf32>, vector<2x8x8xf32> -> vector<2x8x32xf32>
    %77 = vector.shape_cast %76 : vector<2x8x32xf32> to vector<16x32xf32>
    %78 = vector.extract_strided_slice %1 {offsets = [0, 96], sizes = [32, 32], strides = [1, 1]} : vector<32x128xf32> to vector<32x32xf32>
    %cst_22 = arith.constant dense<0.000000e+00> : vector<16x32xf32>
    %79 = tpu.matmul %77, %78, %cst_22 {dimension_numbers = #tpu.dot_dimension_numbers<[1], [0], [0], [1], [0, 0, 1, 1], [], []>} : vector<16x32xf32>, vector<32x32xf32>, vector<16x32xf32> -> vector<16x32xf32>
    %80 = vector.extract_strided_slice %2 {offsets = [0, 96], sizes = [1, 32], strides = [1, 1]} : vector<1x128xf32> to vector<1x32xf32>
    %81 = vector.broadcast %80 : vector<1x32xf32> to vector<16x32xf32>
    %82 = arith.addf %79, %81 : vector<16x32xf32>
    %c0_23 = arith.constant 0 : index
    %c0_24 = arith.constant 0 : index
    %83 = vector.load %arg3[%c0_23, %c0_24] : memref<16x32xf32, #tpu.memory_space<vmem>>, vector<16x32xf32>
    tpu.vector_store %arg3[%c0_23, %c0_24], %82 {strides = array<i32>} : memref<16x32xf32, #tpu.memory_space<vmem>>, vector<16x32xf32>,
    return
  }
}

</mosaic_0001>

<bundles_post_ra>
// kernel: multi_head_attention.1
= control target key start
LH: loop header
LB: loop body
LE: loop exit
PB: predicated region body
PF: predicated region fallthrough
CT: control target
= control target key end

     0   :  { %8 = vsyncpa [#allocation3], 0  ;;  %s1439_s0 = inlined_call_operand.hbm [shape: f32[16,32], index: 0, kind: input, shape index: {}]   ;;  %s1440_s1 = inlined_call_operand.hbm [shape: f32[32,32], index: 1, kind: input, shape index: {}]   ;;  %s1441_s2 = inlined_call_operand.hbm [shape: f32[33,128], index: 2, kind: input, shape index: {}]   ;;  %s1442_s3 = inlined_call_operand.hbm [shape: f32[16,32], index: 3, kind: output, shape index: {}]  }
   0x1   :  { %9 = vsyncpa [#allocation6], 0 }
   0x2   :  { %10 = vsyncpa [#allocation4], 0  ;;  %s28_s14 = sshll.u32 %s1440_s1, 4  ;;  %s1189_s15 = smov [#allocation5]   ;;  %s29_s14 = int_to_ptr.hbm [resolvable:$true] %s28_s14 }
   0x3   :  { %s30_s16 = sshll.u32 %s1189_s15, 4  ;;  %s15_s19 = sshll.u32 %s1439_s0, 4  ;;  %s31_s16 = int_to_ptr.vmem [resolvable:$true] %s30_s16  ;;  %s16_s19 = int_to_ptr.hbm [resolvable:$true] %s15_s19 }
   0x4   :  { %s1190_s20 = smov 128   ;;  %s1191_s21 = smov 8  }
   0x5   :  { %36 = dma.hbm_to_vmem [thread:$0]  %s29_s14, 512, %s31_s16, [#allocation6], %s1190_s20, %s1190_s20, %s1191_s21  }
   0x6   :  { %s1192_s22 = smov [#allocation2]   ;;  %s41_s1 = sshll.u32 %s1441_s2, 4  ;;  %s42_s1 = int_to_ptr.hbm [resolvable:$true] %s41_s1 }
   0x7   :  { %s17_s23 = sshll.u32 %s1192_s22, 4  ;;  %s1193_s0 = smov [#allocation7]   ;;  %s18_s23 = int_to_ptr.vmem [resolvable:$true] %s17_s23 }
   0x8   :  { %23 = dma.hbm_to_vmem [thread:$0]  %s16_s19, 256, %s18_s23, [#allocation3], %s1190_s20, %s1190_s20, %s1191_s21  }
   0x9   :  { %s43_s26 = sshll.u32 %s1193_s0, 4  ;;  %s44_s26 = int_to_ptr.vmem [resolvable:$true] %s43_s26 }
   0xa   :  { %49 = dma.hbm_to_vmem [thread:$0]  %s42_s1, 640, %s44_s26, [#allocation6], %s1190_s20, %s1190_s20, %s1191_s21  }
   0xb   :  { %1183 = dma.done.wait [#allocation3], 256  }
   0xc   :  { %1184 = vsyncadd [#allocation3], 4294967040 }
   0xd   :  { %1185 = dma.done.wait [#allocation6], 1152  }
   0xe   :  { %1186 = vsyncadd [#allocation6], 4294966144  ;;  %v64_v0 = vld [vmem:[#allocation7 + $0x10] sm:$0xff]  ;;  %v65_v1 = vld [vmem:[#allocation7 + $0x18] sm:$0xff]  ;;  %s1194_s2 = smov 96   ;;  %vm74_vm0 = vcmask 261120  }
   0xf   :  { %v1243_v2 = vpack.i.bf16 %v64_v0, %v65_v1  ;;  %93 = vmatpush.msra.mxu0 %v65_v1  ;;  %v62_v3 = vld [vmem:[#allocation7] sm:$0xff]  ;;  %v63_v4 = vld [vmem:[#allocation7 + $0x8] sm:$0xff]  ;;  %v67_v6 = vld [vmem:[#allocation2] sm:$0xff]  ;;  %s1195_s27 = smov 120   ;;  %vm165_vm1 = vcmask 64512   ;;  %s1196_s28 = smov 88  }
  0x10   :  { %v1247_v5 = vpack.i.bf16 %v62_v3, %v63_v4  ;;  %v1252_v7 = vld [vmem:[#allocation7 + $0x20] ss:$0 sm:$0xff]  ;;  %v68_v8 = vld [vmem:[#allocation2 + $0x8] sm:$0xff]  ;;  %v70_v16 = vld [vmem:[#allocation5 + $0x8] sm:$0xff]  ;;  %s1197_s29 = smov 112   ;;  %vm224_vm2 = vcmask 130048  }
  0x11   :  { %995 = vrot.lane.b32.xlu0 %v1243_v2, %s1194_s2  ;;  %94 = vmatpush.msra.mxu0 %v64_v0  ;;  %v69_v15 = vld [vmem:[#allocation5] sm:$0xff]  ;;  %v71_v17 = vld [vmem:[#allocation5 + $0x10] sm:$0xff]  ;;  %v72_v18 = vld [vmem:[#allocation5 + $0x18] sm:$0xff]  ;;  %s1198_s30 = smov 104   ;;  %s1199_s4 = smov 72  }
  0x12   :  { %121 = vrot.lane.b32.xlu1 %v1252_v7, %s1194_s2  ;;  %s1200_s5 = smov 80   ;;  %s1201_s6 = smov 32  }
  0x13   :  { %95 = vmatpush.msra.mxu0 %v63_v4  ;;  %s1202_s7 = smov 16   ;;  %s1203_s8 = smov 24  }
  0x14   :  { %s1204_s9 = smov [#allocation8]   ;;  %s924_s13 = sshll.u32 %s1442_s3, 4  ;;  %s925_s13 = int_to_ptr.hbm [resolvable:$true] %s924_s13 }
  0x15   :  { %96 = vmatpush.msra.mxu0 %v62_v3  ;;  %s922_s10 = sshll.u32 %s1204_s9, 4  ;;  %s923_s10 = int_to_ptr.vmem [resolvable:$true] %s922_s10 }
  0x16   :  { %938 = vmatmul.msk.f32.vlgmr.msra.gmra.mxu0 %vm74_vm0, %v67_v6 }
  0x19   :  { %1000 = vrot.lane.b32.xlu0 %v1247_v5, %s1194_s2 }
  0x1e   :  { %939 = vmatmul.msk.f32.gmra.mxu0 %vm74_vm0, %v68_v8 }
  0x83   :  { %v996_v9 = vpop.permute.xlu0 %995 }
  0x84   :  { %v997_v10 = vunpack.i.l.bf16 %v996_v9  ;;  %v998_v11 = vunpack.i.h.bf16 %v996_v9  ;;  %v122_v19 = vpop.permute.xlu1 %121 }
  0x86   :  { %148 = vmatpush.msra.mxu1 %v997_v10 }
  0x88   :  { %149 = vmatpush.msra.mxu1 %v998_v11 }
  0x8b   :  { %v1001_v12 = vpop.permute.xlu0 %1000 }
  0x8c   :  { %v1002_v13 = vunpack.i.l.bf16 %v1001_v12  ;;  %v1003_v14 = vunpack.i.h.bf16 %v1001_v12 }
  0x8e   :  { %150 = vmatpush.msra.mxu1 %v1002_v13 }
  0x90   :  { %151 = vmatpush.msra.mxu1 %v1003_v14 }
  0x91   :  { %940 = vmatmul.msk.f32.vlgmr.msra.gmra.mxu1 %vm74_vm0, %v69_v15 }
  0x93   :  { %v98_v22 = vpop.f32.mrf.mxu0 }
  0x94   :  { %v1265_v23 = vadd.f32 %v1252_v7, %v98_v22 }
  0x99   :  { %941 = vmatmul.msk.f32.gmra.mxu1 %vm74_vm0, %v70_v16 }
  0x9b   :  { %v101_v27 = vpop.f32.mrf.mxu0 }
  0x9c   :  { %v1282_v28 = vadd.f32 %v1252_v7, %v101_v27 }
  0xa1   :  { %942 = vmatmul.msk.f32.gmra.mxu1 %vm74_vm0, %v71_v17 }
  0xa9   :  { %943 = vmatmul.msk.f32.gmra.mxu1 %vm74_vm0, %v72_v18 }
 0x10e   :  { %v153_v20 = vpop.f32.mrf.mxu1 }
 0x10f   :  { %v1261_v21 = vadd.f32 %v153_v20, %v122_v19 }
 0x111   :  { %333 = vrot.lane.b32.xlu2 %v1261_v21, %s1195_s27 }
 0x116   :  { %v156_v24 = vpop.f32.mrf.mxu1 }
 0x117   :  { %v1267_v25 = vadd.f32 %v156_v24, %v122_v19 }
 0x119   :  { %335 = vrot.lane.b32.xlu1 %v1267_v25, %s1195_s27  ;;  %944 = vmatpush.xpose.msk.msra.mxu3 %vm165_vm1, %v1267_v25  ;;  %v1274_v26 = vpack.i.bf16 %v1261_v21, %v1267_v25 }
 0x11a   :  { %331 = vrot.lane.b32.xlu2 %v1265_v23, %s1195_s27 }
 0x11b   :  { %1010 = vrot.lane.b32.xlu0 %v1274_v26, %s1196_s28 }
 0x11d   :  { %945 = vmatpush.xpose.msk.msra.mxu3 %vm165_vm1, %v1261_v21 }
 0x11e   :  { %v159_v29 = vpop.f32.mrf.mxu1 }
 0x11f   :  { %v1286_v30 = vadd.f32 %v159_v29, %v122_v19 }
 0x120   :  { %946 = vmatmul.msk.f32.vlgmr.msra.gmra.mxu3 %vm165_vm1, %v1265_v23 }
 0x121   :  { %501 = vrot.lane.b32.xlu1 %v1265_v23, %s1197_s29 }
 0x122   :  { %363 = vrot.lane.b32.xlu2 %v1282_v28, %s1195_s27 }
 0x123   :  { %365 = vrot.lane.b32.xlu0 %v1286_v30, %s1195_s27 }
 0x126   :  { %v162_v31 = vpop.f32.mrf.mxu1 }
 0x127   :  { %v1292_v32 = vadd.f32 %v162_v31, %v122_v19 }
 0x129   :  { %947 = vmatpush.xpose.msk.msrb.mxu3 %vm165_vm1, %v1292_v32  ;;  %505 = vrot.lane.b32.xlu1 %v1267_v25, %s1197_s29  ;;  %v1305_v33 = vpack.i.bf16 %v1286_v30, %v1292_v32 }
 0x12a   :  { %503 = vrot.lane.b32.xlu2 %v1261_v21, %s1197_s29 }
 0x12b   :  { %367 = vrot.lane.b32.xlu0 %v1292_v32, %s1195_s27 }
 0x12d   :  { %948 = vmatpush.xpose.msk.msrb.mxu3 %vm165_vm1, %v1286_v30 }
 0x130   :  { %949 = vmatmul.msk.f32.vlgmr.msrb.gmra.mxu3 %vm165_vm1, %v1282_v28 }
 0x131   :  { %1015 = vrot.lane.b32.xlu1 %v1305_v33, %s1194_s2 }
 0x132   :  { %1005 = vrot.lane.b32.xlu2 %v1274_v26, %s1194_s2 }
 0x133   :  { %537 = vrot.lane.b32.xlu0 %v1292_v32, %s1197_s29 }
 0x16b   :  { %v334_v34 = vpop.permute.xlu2 %333 }
 0x174   :  { %v332_v35 = vpop.permute.xlu2 %331 }
 0x17c   :  { %v1315_v36 = vpop.permute.xlu2 %363 }
 0x184   :  { %v1317_v37 = vpop.permute.xlu2 %503 }
 0x18b   :  { %v336_v38 = vpop.permute.xlu1 %335 }
 0x18c   :  { %v1006_v39 = vpop.permute.xlu2 %1005  ;;  %952 = vmatpush.xpose.msk.msrb.mxu0 %vm165_vm1, %v336_v38 }
 0x18d   :  { %v1011_v40 = vpop.permute.xlu0 %1010  ;;  %v1007_v41 = vunpack.i.l.bf16 %v1006_v39  ;;  %v1008_v42 = vunpack.i.h.bf16 %v1006_v39 }
 0x18e   :  { %v1012_v52 = vunpack.i.l.bf16 %v1011_v40  ;;  %v1013_v53 = vunpack.i.h.bf16 %v1011_v40 }
 0x18f   :  { %296 = vmatpush.msra.mxu2 %v1007_v41 }
 0x190   :  { %953 = vmatpush.xpose.msk.msrb.mxu0 %vm165_vm1, %v334_v34 }
 0x191   :  { %297 = vmatpush.msra.mxu2 %v1008_v42 }
 0x193   :  { %v1321_v43 = vpop.permute.xlu1 %501  ;;  %954 = vmatmul.msk.f32.vlgmr.msrb.gmra.mxu0 %vm165_vm1, %v332_v35 }
 0x195   :  { %v366_v44 = vpop.permute.xlu0 %365 }
 0x19b   :  { %v1324_v45 = vpop.permute.xlu1 %505 }
 0x19d   :  { %v368_v46 = vpop.permute.xlu0 %367 }
 0x19e   :  { %955 = vmatpush.xpose.msk.msrb.mxu2 %vm165_vm1, %v368_v46 }
 0x1a2   :  { %956 = vmatpush.xpose.msk.msrb.mxu2 %vm165_vm1, %v366_v44 }
 0x1a3   :  { %v1016_v47 = vpop.permute.xlu1 %1015  ;;  %v192_v48 = vpop.f32.mrf.mxu3 }
 0x1a4   :  { %v1017_v49 = vunpack.i.l.bf16 %v1016_v47  ;;  %v225_v50 = vsel %vm224_vm2, %v192_v48, -inf  ;;  %v1018_v51 = vunpack.i.h.bf16 %v1016_v47 }
 0x1a5   :  { %226 = vmax.xlane.f32.xlu0 %v225_v50  ;;  %v538_v63 = vpop.permute.xlu0 %537 }
 0x1a6   :  { %325 = vmatpush.msra.mxu3 %v1017_v49 }
 0x1a8   :  { %326 = vmatpush.msra.mxu3 %v1018_v51 }
 0x1aa   :  { %466 = vmatpush.msrb.mxu3 %v1012_v52 }
 0x1ac   :  { %467 = vmatpush.msrb.mxu3 %v1013_v53 }
 0x1b3   :  { %v221_v54 = vpop.f32.mrf.mxu3 }
 0x1b4   :  { %v228_v55 = vsel %vm224_vm2, %v221_v54, -inf }
 0x1b5   :  { %229 = vmax.xlane.f32.xlu1 %v228_v55 }
 0x1b9   :  { %673 = vrot.lane.b32.xlu0 %v1261_v21, %s1198_s30 }
 0x1ce   :  { %535 = vrot.lane.b32.xlu1 %v1286_v30, %s1197_s29 }
 0x1d6   :  { %671 = vrot.lane.b32.xlu1 %v1265_v23, %s1198_s30 }
 0x210   :  { %v360_v56 = vpop.f32.mrf.mxu0 }
 0x211   :  { %v395_v57 = vsel %vm224_vm2, %v360_v56, -inf }
 0x212   :  { %396 = vmax.xlane.f32.xlu2 %v395_v57 }
 0x218   :  { %v227_v0 = vpop.xlane.xlu0 %226 }
 0x219   :  { %v231_v1 = vsub.f32 %v192_v48, %v227_v0 }
 0x21b   :  { %v233_v3 = vmul.f32 1.442695, %v231_v1 }
 0x228   :  { %v230_v58 = vpop.xlane.xlu1 %229 }
 0x229   :  { %v232_v59 = vsub.f32 %v221_v54, %v230_v58 }
 0x22a   :  { %675 = vrot.lane.b32.xlu2 %v1267_v25, %s1198_s30 }
 0x22b   :  { %v235_v60 = vmul.f32 1.442695, %v232_v59  ;;  %v674_v13 = vpop.permute.xlu0 %673 }
 0x22d   :  { %1055 = vpow2.f32 %v235_v60 }
 0x22e   :  { %1057 = vpow2.f32 %v233_v3 }
 0x233   :  { %v1056_v61 = vpop.eup %1055 }
 0x234   :  { %v240_v62 = vsel %vm224_vm2, %v1056_v61, 0.0  ;;  %v1058_v4 = vpop.eup %1057 }
 0x235   :  { %241 = vadd.xlane.f32.xlu0 %v240_v62  ;;  %v237_v6 = vsel %vm224_vm2, %v1058_v4, 0.0 }
 0x249   :  { %707 = vrot.lane.b32.xlu0 %v1292_v32, %s1198_s30 }
 0x253   :  { %238 = vadd.xlane.f32.xlu2 %v237_v6 }
 0x26b   :  { %533 = vrot.lane.b32.xlu2 %v1282_v28, %s1197_s29 }
 0x273   :  { %705 = vrot.lane.b32.xlu2 %v1286_v30, %s1198_s30 }
 0x285   :  { %v397_v8 = vpop.xlane.xlu2 %396 }
 0x286   :  { %v401_v9 = vsub.f32 %v360_v56, %v397_v8 }
 0x288   :  { %v403_v10 = vmul.f32 1.442695, %v401_v9 }
 0x28a   :  { %1059 = vpow2.f32 %v403_v10 }
 0x28d   :  { %v676_v27 = vpop.permute.xlu2 %675 }
 0x290   :  { %v1347_v11 = vpop.eup %1059 }
 0x291   :  { %v407_v12 = vsel %vm224_vm2, %v1347_v11, 0.0 }
 0x292   :  { %408 = vadd.xlane.f32.xlu1 %v407_v12 }
 0x2a8   :  { %v242_v14 = vpop.xlane.xlu0 %241 }
 0x2a9   :  { %1061 = vrcp.f32 %v242_v14  ;;  %v269_v18 = vand.u32 2147483648, %v242_v14  ;;  %v267_v20 = vand.u32 2147483647, %v242_v14  ;;  %vm263_vm4 = vweird.f32 %v242_v14 }
 0x2ab   :  { %703 = vrot.lane.b32.xlu1 %v1282_v28, %s1198_s30  ;;  %v270_v22 = vor.u32 1.1754944e-38, %v269_v18  ;;  %vm268_vm6 = vcmp.eq.f32.partialorder %v267_v20, 8.507059e+37  ;;  %v536_v28 = vpop.permute.xlu1 %535 }
 0x2af   :  { %v1062_v15 = vpop.eup %1061 }
 0x2b0   :  { %v259_v16 = vmul.f32 %v1062_v15, %v242_v14  ;;  %vm264_vm3 = vweird.f32 %v1062_v15 }
 0x2b1   :  { %vm265_vm5 = vmor %vm263_vm4, %vm264_vm3 }
 0x2b2   :  { %v260_v17 = vsub.f32 1.0, %v259_v16 }
 0x2b3   :  { %v672_v46 = vpop.permute.xlu1 %671 }
 0x2b4   :  { %v261_v19 = vmul.f32 %v1062_v15, %v260_v17 }
 0x2b6   :  { %v262_v21 = vadd.f32 %v1062_v15, %v261_v19 }
 0x2b8   :  { %v266_v23 = vsel %vm265_vm5, %v1062_v15, %v262_v21 }
 0x2b9   :  { %v271_v24 = vsel %vm268_vm6, %v270_v22, %v266_v23 }
 0x2ba   :  { %v272_v25 = vmul.f32 %v1056_v61, %v271_v24 }
 0x2bb   :  { %v708_v56 = vpop.permute.xlu0 %707 }
 0x2bc   :  { %951 = vmatmul.msk.f32.vlgmr.msra.gmra.mxu3 %vm224_vm2, %v272_v25 }
 0x2bd   :  { %963 = vmatpush.xpose.msk.msra.mxu3 %vm165_vm1, %v538_v63 }
 0x2c1   :  { %964 = vmatpush.xpose.msk.msra.mxu3 %vm165_vm1, %v536_v28 }
 0x2c6   :  { %v239_v29 = vpop.xlane.xlu2 %238 }
 0x2c7   :  { %1063 = vrcp.f32 %v239_v29  ;;  %v254_v34 = vand.u32 2147483648, %v239_v29  ;;  %v252_v38 = vand.u32 2147483647, %v239_v29  ;;  %vm248_vm8 = vweird.f32 %v239_v29 }
 0x2c9   :  { %v255_v40 = vor.u32 1.1754944e-38, %v254_v34  ;;  %vm253_vm10 = vcmp.eq.f32.partialorder %v252_v38, 8.507059e+37 }
 0x2cd   :  { %v1064_v30 = vpop.eup %1063 }
 0x2ce   :  { %v244_v31 = vmul.f32 %v1064_v30, %v239_v29  ;;  %vm249_vm7 = vweird.f32 %v1064_v30 }
 0x2cf   :  { %vm250_vm9 = vmor %vm248_vm8, %vm249_vm7 }
 0x2d0   :  { %v245_v32 = vsub.f32 1.0, %v244_v31 }
 0x2d2   :  { %v246_v35 = vmul.f32 %v1064_v30, %v245_v32 }
 0x2d4   :  { %v247_v39 = vadd.f32 %v1064_v30, %v246_v35 }
 0x2d6   :  { %v251_v41 = vsel %vm250_vm9, %v1064_v30, %v247_v39 }
 0x2d7   :  { %v256_v42 = vsel %vm253_vm10, %v255_v40, %v251_v41 }
 0x2d8   :  { %v257_v44 = vmul.f32 %v1058_v4, %v256_v42 }
 0x2da   :  { %950 = vmatmul.msk.f32.vlgmr.msra.gmra.mxu2 %vm224_vm2, %v257_v44 }
 0x2db   :  { %960 = vmatpush.xpose.msk.msra.mxu2 %vm165_vm1, %v1324_v45 }
 0x2df   :  { %961 = vmatpush.xpose.msk.msra.mxu2 %vm165_vm1, %v1317_v37 }
 0x2e2   :  { %957 = vmatmul.msk.f32.vlgmr.msrb.gmra.mxu2 %vm165_vm1, %v1315_v36  ;;  %v534_v36 = vpop.permute.xlu2 %533 }
 0x2e3   :  { %968 = vmatpush.xpose.msk.msrb.mxu2 %vm165_vm1, %v676_v27 }
 0x2e7   :  { %969 = vmatpush.xpose.msk.msrb.mxu2 %vm165_vm1, %v674_v13 }
 0x2ea   :  { %962 = vmatmul.msk.f32.vlgmr.msra.gmra.mxu2 %vm165_vm1, %v1321_v43  ;;  %v706_v57 = vpop.permute.xlu2 %705 }
 0x2f2   :  { %970 = vmatmul.msk.f32.vlgmr.msrb.gmra.mxu2 %vm165_vm1, %v672_v46 }
 0x305   :  { %v409_v47 = vpop.xlane.xlu1 %408 }
 0x306   :  { %1065 = vrcp.f32 %v409_v47  ;;  %v424_v50 = vand.u32 2147483648, %v409_v47  ;;  %v422_v51 = vand.u32 2147483647, %v409_v47  ;;  %vm418_vm12 = vweird.f32 %v409_v47 }
 0x308   :  { %v425_v53 = vor.u32 1.1754944e-38, %v424_v50  ;;  %vm423_vm14 = vcmp.eq.f32.partialorder %v422_v51, 8.507059e+37 }
 0x30c   :  { %v1066_v48 = vpop.eup %1065 }
 0x30d   :  { %v414_v45 = vmul.f32 %v1066_v48, %v409_v47  ;;  %vm419_vm11 = vweird.f32 %v1066_v48 }
 0x30e   :  { %vm420_vm13 = vmor %vm418_vm12, %vm419_vm11 }
 0x30f   :  { %v415_v49 = vsub.f32 1.0, %v414_v45 }
 0x311   :  { %v416_v37 = vmul.f32 %v1066_v48, %v415_v49 }
 0x313   :  { %v417_v52 = vadd.f32 %v1066_v48, %v416_v37 }
 0x315   :  { %v421_v54 = vsel %vm420_vm13, %v1066_v48, %v417_v52 }
 0x316   :  { %v426_v43 = vsel %vm423_vm14, %v425_v53, %v421_v54 }
 0x317   :  { %v427_v55 = vmul.f32 %v1347_v11, %v426_v43 }
 0x319   :  { %958 = vmatmul.msk.f32.vlgmr.msrb.gmra.mxu3 %vm224_vm2, %v427_v55 }
 0x31a   :  { %971 = vmatpush.xpose.msk.msrb.mxu3 %vm165_vm1, %v708_v56 }
 0x31d   :  { %v704_v58 = vpop.permute.xlu1 %703 }
 0x31e   :  { %972 = vmatpush.xpose.msk.msrb.mxu3 %vm165_vm1, %v706_v57 }
 0x321   :  { %965 = vmatmul.msk.f32.vlgmr.msra.gmra.mxu3 %vm165_vm1, %v534_v36 }
 0x329   :  { %973 = vmatmul.msk.f32.vlgmr.msrb.gmra.mxu3 %vm165_vm1, %v704_v58 }
 0x33f   :  { %v1381_v3 = vpop.f32.mrf.mxu3 }
 0x35d   :  { %v1374_v59 = vpop.f32.mrf.mxu2 }
 0x365   :  { %v392_v60 = vpop.f32.mrf.mxu2 }
 0x366   :  { %v398_v61 = vsel %vm224_vm2, %v392_v60, -inf }
 0x367   :  { %399 = vmax.xlane.f32.xlu0 %v398_v61 }
 0x36d   :  { %v530_v62 = vpop.f32.mrf.mxu2 }
 0x36e   :  { %v565_v63 = vsel %vm224_vm2, %v530_v62, -inf }
 0x36f   :  { %566 = vmax.xlane.f32.xlu2 %v565_v63 }
 0x375   :  { %v700_v0 = vpop.f32.mrf.mxu2 }
 0x376   :  { %v735_v1 = vsel %vm224_vm2, %v700_v0, -inf }
 0x377   :  { %736 = vmax.xlane.f32.xlu0 %v735_v1 }
 0x38b   :  { %1020 = vrot.lane.b32.xlu0 %v1305_v33, %s1196_s28 }
 0x39c   :  { %v469_v4 = vpop.f32.mrf.mxu3 }
 0x3a4   :  { %v562_v6 = vpop.f32.mrf.mxu3 }
 0x3a5   :  { %v568_v8 = vsel %vm224_vm2, %v562_v6, -inf }
 0x3a6   :  { %569 = vmax.xlane.f32.xlu1 %v568_v8 }
 0x3ac   :  { %v732_v9 = vpop.f32.mrf.mxu3 }
 0x3ad   :  { %v738_v10 = vsel %vm224_vm2, %v732_v9, -inf }
 0x3ae   :  { %739 = vmax.xlane.f32.xlu2 %v738_v10 }
 0x3da   :  { %v400_v11 = vpop.xlane.xlu0 %399 }
 0x3db   :  { %v402_v12 = vsub.f32 %v392_v60, %v400_v11 }
 0x3dd   :  { %v405_v13 = vmul.f32 1.442695, %v402_v12 }
 0x3df   :  { %1067 = vpow2.f32 %v405_v13 }
 0x3e2   :  { %v567_v14 = vpop.xlane.xlu2 %566 }
 0x3e3   :  { %v571_v15 = vsub.f32 %v530_v62, %v567_v14 }
 0x3e5   :  { %v1068_v16 = vpop.eup %1067  ;;  %v573_v17 = vmul.f32 1.442695, %v571_v15 }
 0x3e6   :  { %v410_v18 = vsel %vm224_vm2, %v1068_v16, 0.0 }
 0x3e7   :  { %1069 = vpow2.f32 %v573_v17  ;;  %411 = vadd.xlane.f32.xlu1 %v410_v18 }
 0x3ea   :  { %v737_v19 = vpop.xlane.xlu0 %736 }
 0x3eb   :  { %v741_v20 = vsub.f32 %v700_v0, %v737_v19 }
 0x3ed   :  { %v1386_v21 = vpop.eup %1069  ;;  %v743_v22 = vmul.f32 1.442695, %v741_v20 }
 0x3ee   :  { %v577_v23 = vsel %vm224_vm2, %v1386_v21, 0.0 }
 0x3ef   :  { %1071 = vpow2.f32 %v743_v22  ;;  %578 = vadd.xlane.f32.xlu0 %v577_v23 }
 0x3f5   :  { %v1390_v24 = vpop.eup %1071 }
 0x3f6   :  { %v747_v25 = vsel %vm224_vm2, %v1390_v24, 0.0 }
 0x3f7   :  { %748 = vadd.xlane.f32.xlu1 %v747_v25 }
 0x3fd   :  { %v1021_v27 = vpop.permute.xlu0 %1020 }
 0x3fe   :  { %v1022_v28 = vunpack.i.l.bf16 %v1021_v27  ;;  %v1023_v29 = vunpack.i.h.bf16 %v1021_v27 }
 0x400   :  { %495 = vmatpush.msra.mxu0 %v1022_v28 }
 0x402   :  { %496 = vmatpush.msra.mxu0 %v1023_v29 }
 0x403   :  { %1035 = vrot.lane.b32.xlu0 %v1274_v26, %s1199_s4 }
 0x40b   :  { %1040 = vrot.lane.b32.xlu0 %v1305_v33, %s1199_s4 }
 0x410   :  { %1025 = vrot.lane.b32.xlu1 %v1274_v26, %s1200_s5 }
 0x413   :  { %1050 = vrot.lane.b32.xlu0 %v1247_v5, %s1201_s6 }
 0x418   :  { %1045 = vrot.lane.b32.xlu1 %v1243_v2, %s1201_s6 }
 0x419   :  { %v570_v30 = vpop.xlane.xlu1 %569 }
 0x41a   :  { %v572_v31 = vsub.f32 %v562_v6, %v570_v30 }
 0x41c   :  { %v575_v32 = vmul.f32 1.442695, %v572_v31 }
 0x41e   :  { %1073 = vpow2.f32 %v575_v32 }
 0x421   :  { %v740_v34 = vpop.xlane.xlu2 %739 }
 0x422   :  { %v742_v35 = vsub.f32 %v732_v9, %v740_v34 }
 0x424   :  { %v1397_v38 = vpop.eup %1073  ;;  %v745_v39 = vmul.f32 1.442695, %v742_v35 }
 0x425   :  { %v580_v40 = vsel %vm224_vm2, %v1397_v38, 0.0 }
 0x426   :  { %1075 = vpow2.f32 %v745_v39  ;;  %581 = vadd.xlane.f32.xlu2 %v580_v40 }
 0x42c   :  { %v1401_v41 = vpop.eup %1075 }
 0x42d   :  { %v750_v42 = vsel %vm224_vm2, %v1401_v41, 0.0 }
 0x42e   :  { %751 = vadd.xlane.f32.xlu2 %v750_v42 }
 0x446   :  { %1030 = vrot.lane.b32.xlu2 %v1305_v33, %s1200_s5 }
 0x44e   :  { %843 = vrot.lane.b32.xlu2 %v469_v4, %s1191_s21 }
 0x45a   :  { %v412_v26 = vpop.xlane.xlu1 %411 }
 0x45b   :  { %1077 = vrcp.f32 %v412_v26  ;;  %v439_v45 = vand.u32 2147483648, %v412_v26  ;;  %v437_v50 = vand.u32 2147483647, %v412_v26  ;;  %vm433_vm3 = vweird.f32 %v412_v26 }
 0x45d   :  { %v440_v51 = vor.u32 1.1754944e-38, %v439_v45  ;;  %vm438_vm5 = vcmp.eq.f32.partialorder %v437_v50, 8.507059e+37 }
 0x461   :  { %v1078_v44 = vpop.eup %1077 }
 0x462   :  { %v429_v46 = vmul.f32 %v1078_v44, %v412_v26  ;;  %v579_v48 = vpop.xlane.xlu0 %578  ;;  %vm434_vm15 = vweird.f32 %v1078_v44 }
 0x463   :  { %1079 = vrcp.f32 %v579_v48  ;;  %vm435_vm4 = vmor %vm433_vm3, %vm434_vm15  ;;  %v594_v62 = vand.u32 2147483648, %v579_v48  ;;  %vm588_vm7 = vweird.f32 %v579_v48  ;;  %v592_v63 = vand.u32 2147483647, %v579_v48 }
 0x464   :  { %v430_v47 = vsub.f32 1.0, %v429_v46 }
 0x465   :  { %v595_v4 = vor.u32 1.1754944e-38, %v594_v62  ;;  %vm593_vm9 = vcmp.eq.f32.partialorder %v592_v63, 8.507059e+37 }
 0x466   :  { %v431_v49 = vmul.f32 %v1078_v44, %v430_v47 }
 0x468   :  { %v432_v37 = vadd.f32 %v1078_v44, %v431_v49 }
 0x469   :  { %v1080_v54 = vpop.eup %1079 }
 0x46a   :  { %v436_v36 = vsel %vm435_vm4, %v1078_v44, %v432_v37  ;;  %v749_v52 = vpop.xlane.xlu1 %748  ;;  %v584_v43 = vmul.f32 %v1080_v54, %v579_v48  ;;  %vm589_vm6 = vweird.f32 %v1080_v54 }
 0x46b   :  { %v441_v33 = vsel %vm438_vm5, %v440_v51, %v436_v36  ;;  %1081 = vrcp.f32 %v749_v52  ;;  %vm590_vm8 = vmor %vm588_vm7, %vm589_vm6  ;;  %v764_v12 = vand.u32 2147483648, %v749_v52  ;;  %vm758_vm11 = vweird.f32 %v749_v52 }
 0x46c   :  { %v442_v53 = vmul.f32 %v1068_v16, %v441_v33  ;;  %v585_v55 = vsub.f32 1.0, %v584_v43  ;;  %v762_v14 = vand.u32 2147483647, %v749_v52 }
 0x46d   :  { %v765_v18 = vor.u32 1.1754944e-38, %v764_v12 }
 0x46e   :  { %959 = vmatmul.msk.f32.vlgmr.msra.gmra.mxu0 %vm224_vm2, %v442_v53  ;;  %v586_v57 = vmul.f32 %v1080_v54, %v585_v55  ;;  %vm763_vm13 = vcmp.eq.f32.partialorder %v762_v14, 8.507059e+37 }
 0x470   :  { %v587_v60 = vadd.f32 %v1080_v54, %v586_v57 }
 0x471   :  { %v1082_v56 = vpop.eup %1081 }
 0x472   :  { %v754_v58 = vmul.f32 %v1082_v56, %v749_v52  ;;  %v591_v0 = vsel %vm590_vm8, %v1080_v54, %v587_v60  ;;  %vm759_vm10 = vweird.f32 %v1082_v56 }
 0x473   :  { %v596_v8 = vsel %vm593_vm9, %v595_v4, %v591_v0  ;;  %vm760_vm12 = vmor %vm758_vm11, %vm759_vm10  ;;  %vm869_vm9 = vcmask 195584  }
 0x474   :  { %v755_v61 = vsub.f32 1.0, %v754_v58  ;;  %v597_v15 = vmul.f32 %v1386_v21, %v596_v8 }
 0x475   :  { %v1036_v11 = vpop.permute.xlu0 %1035 }
 0x476   :  { %v756_v1 = vmul.f32 %v1082_v56, %v755_v61  ;;  %v1037_v16 = vunpack.i.l.bf16 %v1036_v11  ;;  %v1038_v19 = vunpack.i.h.bf16 %v1036_v11 }
 0x478   :  { %v757_v10 = vadd.f32 %v1082_v56, %v756_v1 }
 0x47a   :  { %v761_v17 = vsel %vm760_vm12, %v1082_v56, %v757_v10 }
 0x47b   :  { %v766_v20 = vsel %vm763_vm13, %v765_v18, %v761_v17 }
 0x47c   :  { %v767_v22 = vmul.f32 %v1390_v24, %v766_v20 }
 0x47d   :  { %v1041_v26 = vpop.permute.xlu0 %1040 }
 0x47e   :  { %v1042_v50 = vunpack.i.l.bf16 %v1041_v26  ;;  %v1043_v51 = vunpack.i.h.bf16 %v1041_v26 }
 0x482   :  { %v1026_v6 = vpop.permute.xlu1 %1025 }
 0x483   :  { %v1027_v9 = vunpack.i.l.bf16 %v1026_v6  ;;  %v1028_v13 = vunpack.i.h.bf16 %v1026_v6 }
 0x485   :  { %636 = vmatpush.msrb.mxu0 %v1027_v9  ;;  %v1051_v2 = vpop.permute.xlu0 %1050 }
 0x486   :  { %v1052_v60 = vunpack.i.l.bf16 %v1051_v2  ;;  %v1053_v61 = vunpack.i.h.bf16 %v1051_v2 }
 0x487   :  { %637 = vmatpush.msrb.mxu0 %v1028_v13 }
 0x488   :  { %966 = vmatmul.msk.f32.vlgmr.msrb.gmra.mxu0 %vm224_vm2, %v597_v15 }
 0x489   :  { %806 = vmatpush.msra.mxu0 %v1037_v16 }
 0x48a   :  { %v1046_v56 = vpop.permute.xlu1 %1045 }
 0x48b   :  { %807 = vmatpush.msra.mxu0 %v1038_v19  ;;  %v1048_v57 = vunpack.i.h.bf16 %v1046_v56  ;;  %v1047_v58 = vunpack.i.l.bf16 %v1046_v56 }
 0x48d   :  { %905 = vmatpush.msra.mxu2 %v1047_v58 }
 0x48f   :  { %906 = vmatpush.msra.mxu2 %v1048_v57 }
 0x490   :  { %974 = vmatmul.msk.f32.vlgmr.msra.gmra.mxu0 %vm224_vm2, %v767_v22 }
 0x491   :  { %907 = vmatpush.msra.mxu2 %v1052_v60 }
 0x493   :  { %908 = vmatpush.msra.mxu2 %v1053_v61 }
 0x499   :  { %v582_v23 = vpop.xlane.xlu2 %581 }
 0x49a   :  { %1083 = vrcp.f32 %v582_v23  ;;  %v609_v29 = vand.u32 2147483648, %v582_v23  ;;  %v607_v31 = vand.u32 2147483647, %v582_v23  ;;  %vm603_vm15 = vweird.f32 %v582_v23 }
 0x49c   :  { %v610_v34 = vor.u32 1.1754944e-38, %v609_v29  ;;  %vm608_vm4 = vcmp.eq.f32.partialorder %v607_v31, 8.507059e+37 }
 0x4a0   :  { %v1084_v21 = vpop.eup %1083 }
 0x4a1   :  { %v599_v25 = vmul.f32 %v1084_v21, %v582_v23  ;;  %v752_v27 = vpop.xlane.xlu2 %751  ;;  %vm604_vm14 = vweird.f32 %v1084_v21 }
 0x4a2   :  { %1085 = vrcp.f32 %v752_v27  ;;  %vm605_vm3 = vmor %vm603_vm15, %vm604_vm14  ;;  %v779_v46 = vand.u32 2147483648, %v752_v27  ;;  %v777_v45 = vand.u32 2147483647, %v752_v27  ;;  %vm773_vm6 = vweird.f32 %v752_v27 }
 0x4a3   :  { %v600_v28 = vsub.f32 1.0, %v599_v25 }
 0x4a4   :  { %v780_v36 = vor.u32 1.1754944e-38, %v779_v46  ;;  %vm778_vm8 = vcmp.eq.f32.partialorder %v777_v45, 8.507059e+37 }
 0x4a5   :  { %v601_v30 = vmul.f32 %v1084_v21, %v600_v28 }
 0x4a7   :  { %v602_v32 = vadd.f32 %v1084_v21, %v601_v30 }
 0x4a8   :  { %v1086_v24 = vpop.eup %1085 }
 0x4a9   :  { %v769_v35 = vmul.f32 %v1086_v24, %v752_v27  ;;  %v1031_v39 = vpop.permute.xlu2 %1030  ;;  %v606_v40 = vsel %vm605_vm3, %v1084_v21, %v602_v32  ;;  %vm774_vm5 = vweird.f32 %v1086_v24 }
 0x4aa   :  { %v1032_v5 = vunpack.i.l.bf16 %v1031_v39  ;;  %v611_v42 = vsel %vm608_vm4, %v610_v34, %v606_v40  ;;  %v1033_v47 = vunpack.i.h.bf16 %v1031_v39  ;;  %vm775_vm7 = vmor %vm773_vm6, %vm774_vm5 }
 0x4ab   :  { %v770_v44 = vsub.f32 1.0, %v769_v35  ;;  %v612_v49 = vmul.f32 %v1397_v38, %v611_v42 }
 0x4ac   :  { %665 = vmatpush.msrb.mxu1 %v1032_v5 }
 0x4ad   :  { %v771_v48 = vmul.f32 %v1086_v24, %v770_v44 }
 0x4ae   :  { %666 = vmatpush.msrb.mxu1 %v1033_v47 }
 0x4af   :  { %v772_v37 = vadd.f32 %v1086_v24, %v771_v48  ;;  %967 = vmatmul.msk.f32.vlgmr.msrb.gmra.mxu1 %vm224_vm2, %v612_v49 }
 0x4b0   :  { %835 = vmatpush.msra.mxu1 %v1042_v50 }
 0x4b1   :  { %v776_v33 = vsel %vm775_vm7, %v1086_v24, %v772_v37 }
 0x4b2   :  { %v781_v52 = vsel %vm778_vm8, %v780_v36, %v776_v33  ;;  %836 = vmatpush.msra.mxu1 %v1043_v51 }
 0x4b3   :  { %v782_v53 = vmul.f32 %v1401_v41, %v781_v52 }
 0x4b7   :  { %975 = vmatmul.msk.f32.vlgmr.msra.gmra.mxu1 %vm224_vm2, %v782_v53 }
 0x4eb   :  { %v498_v38 = vpop.f32.mrf.mxu0 }
 0x4ec   :  { %845 = vrot.lane.b32.xlu0 %v498_v38, %s1191_s21 }
 0x4f4   :  { %884 = vrot.lane.b32.xlu0 %v1252_v7, %s1201_s6  ;;  %v844_v7 = vpop.permute.xlu2 %843 }
 0x4f5   :  { %v865_v62 = vsel %vm165_vm1, %v1374_v59, %v844_v7 }
 0x505   :  { %v639_v54 = vpop.f32.mrf.mxu0 }
 0x506   :  { %851 = vrot.lane.b32.xlu1 %v639_v54, %s1202_s7 }
 0x50d   :  { %v809_v43 = vpop.f32.mrf.mxu0 }
 0x50e   :  { %859 = vrot.lane.b32.xlu2 %v809_v43, %s1203_s8 }
 0x52c   :  { %v668_v55 = vpop.f32.mrf.mxu1 }
 0x52d   :  { %853 = vrot.lane.b32.xlu1 %v668_v55, %s1202_s7 }
 0x534   :  { %v838_v41 = vpop.f32.mrf.mxu1 }
 0x535   :  { %861 = vrot.lane.b32.xlu2 %v838_v41, %s1203_s8 }
 0x55e   :  { %v846_v6 = vpop.permute.xlu0 %845 }
 0x55f   :  { %v866_v8 = vsel %vm165_vm1, %v1381_v3, %v846_v6 }
 0x566   :  { %v885_v13 = vpop.permute.xlu0 %884 }
 0x568   :  { %v860_v0 = vpop.permute.xlu2 %859 }
 0x578   :  { %v852_v63 = vpop.permute.xlu1 %851 }
 0x579   :  { %v867_v1 = vsel %vm224_vm2, %v865_v62, %v852_v63 }
 0x57a   :  { %v870_v4 = vsel %vm869_vm9, %v867_v1, %v860_v0 }
 0x57b   :  { %976 = vmatmul.msk.f32.vlgmr.msra.gmra.mxu2 %vm74_vm0, %v870_v4 }
 0x58f   :  { %v862_v10 = vpop.permute.xlu2 %861 }
 0x59f   :  { %v854_v9 = vpop.permute.xlu1 %853 }
 0x5a0   :  { %v868_v11 = vsel %vm224_vm2, %v866_v8, %v854_v9 }
 0x5a1   :  { %v871_v12 = vsel %vm869_vm9, %v868_v11, %v862_v10 }
 0x5a2   :  { %977 = vmatmul.msk.f32.gmra.mxu2 %vm74_vm0, %v871_v12 }
 0x5fe   :  { %v910_v59 = vpop.f32.mrf.mxu2 }
 0x5ff   :  { %v911_v14 = vadd.f32 %v910_v59, %v885_v13 }
 0x601   :  { %916 = vst.msk [vmem:[#allocation8] sm:$0xff] %vm74_vm0, %v911_v14 }
 0x625   :  { %v913_v15 = vpop.f32.mrf.mxu2 }
 0x626   :  { %v914_v3 = vadd.f32 %v913_v15, %v885_v13 }
 0x628   :  { %917 = vst.msk [vmem:[#allocation8 + $0x8] sm:$0xff] %vm74_vm0, %v914_v3 }
 0x629   :  { %930 = dma.vmem_to_hbm [thread:$0]  %s923_s10, 256, %s925_s13, [#allocation4], %s1190_s20, %s1190_s20, %s1191_s21  }
 0x62a   :  { %1187 = dma.done.wait [#allocation4], 256  }
 0x62b   :  { %1188 = vsyncadd [#allocation4], 4294967040 }
 0x62c   :  { %935 = vsyncpa [#allocation3], 1 }
 0x62d   :  { %936 = vsyncpa [#allocation6], 1 }
 0x62e   :  { %937 = vsyncpa [#allocation4], 1 }

</bundles_post_ra>
